<compile_context>
chip_gen: v6e
topology: v6e:2x2x1
jax: 0.10.0
libtpu: 0.0.40
codegen_flags: <defaults>
</compile_context>

<pallas_src>
import functools

import jax
import jax.numpy as jnp
from jax.experimental import pallas as pl
from jax.experimental.pallas import tpu as pltpu


def _lstm_kernel(x_ref, wih_ref, whh_ref, b_ref, wlin_ref, blin_ref, y_ref, proj_ref,
                 *, hidden_size, seq_len, batch, matmul_dtype):
    """Single-layer LSTM over the full sequence + last-step Linear head.

    x_ref    : (T*B, A)  time-major rows (row t*B + b == timestep t, batch b)
    wih_ref  : (A, 4H), whh_ref: (H, 4H), b_ref: (1, 4H)   (gate order i, f, g, o)
    wlin_ref : (1, H)   (PyTorch nn.Linear weight layout), blin_ref: (1, 1)
    y_ref    : (B, 1)
    proj_ref : VMEM scratch (T*B, 4H) holding the hoisted input projection.
    """
    H, T, B = hidden_size, seq_len, batch

    w_ih = wih_ref[...].astype(matmul_dtype)        # (A, 4H)
    w_hh = whh_ref[...].astype(matmul_dtype)        # (H, 4H)
    bias = b_ref[...]                               # (1, 4H) f32

    # Hoisted input projection: one (T*B, A) x (A, 4H) MXU op for all timesteps,
    # written to VMEM and re-read per step (cheap leading-axis address math).
    x_all = x_ref[...].astype(matmul_dtype)         # (T*B, A)
    proj_ref[...] = jnp.dot(x_all, w_ih, preferred_element_type=jnp.float32) + bias

    h = jnp.zeros((B, H), jnp.float32)              # zero-init hidden_cell (as in module)
    c = jnp.zeros((B, H), jnp.float32)

    # Fully-unrolled recurrence: per step only one (B,H)x(H,4H) matmul and two
    # full-vreg EUP passes remain on the serial critical path.
    for t in range(T):
        g_x = proj_ref[pl.ds(t * B, B), :]                            # (B, 4H)
        gates = g_x + jnp.dot(h.astype(matmul_dtype), w_hh,
                              preferred_element_type=jnp.float32)     # (B, 4H)
        sg = jax.nn.sigmoid(gates)     # one EUP pass: holds i, f, o in their lane slots
        th = jnp.tanh(gates)           # one EUP pass: holds g in its lane slot
        c = sg[:, 1 * H:2 * H] * c + sg[:, 0 * H:1 * H] * th[:, 2 * H:3 * H]
        h = sg[:, 3 * H:4 * H] * jnp.tanh(c)

    # NOTE: the PyTorch forward contains `print(...); exit()` before the Linear —
    # debugging artifact; the intended computation (Linear on the last hidden state)
    # is implemented here.
    # Final Linear as VPU multiply + lane reduce (avoids a pathological N=1 MXU matmul).
    w_lin = wlin_ref[...]                            # (1, H)
    b_lin = blin_ref[...]                            # (1, 1)
    y = jnp.sum(h * w_lin, axis=-1, keepdims=True) + b_lin
    y_ref[...] = y.astype(y_ref.dtype)


def lstm_model1_forward(x, w_ih, w_hh, bias, w_lin, b_lin, *,
                        hidden_size, matmul_dtype=jnp.float32):
    """x: (B, T, A) -> y: (B, 1). Set matmul_dtype=jnp.bfloat16 on v6e/v7x."""
    B, T, A = x.shape
    H = hidden_size

    # Layout plumbing outside the kernel: time-major rows so the per-step read
    # inside the kernel is a contiguous leading-axis slice.
    x_tb = jnp.transpose(x, (1, 0, 2)).reshape(T * B, A)

    vmem = lambda: pl.BlockSpec(memory_space=pltpu.MemorySpace.VMEM)

    # No grid: everything (a few KB) lives in VMEM for the whole kernel. If batch
    # ever grows, add a batch grid axis with dimension_semantics=("parallel",) so
    # v7x's second TensorCore is used, and size tiles against 64 MiB VMEM there.
    return pl.pallas_call(
        functools.partial(_lstm_kernel, hidden_size=H, seq_len=T, batch=B,
                          matmul_dtype=matmul_dtype),
        out_shape=jax.ShapeDtypeStruct((B, 1), jnp.float32),
        in_specs=[vmem() for _ in range(6)],
        out_specs=vmem(),
        scratch_shapes=[pltpu.VMEM((T * B, 4 * H), jnp.float32)],
    )(x_tb, w_ih, w_hh, bias, w_lin, b_lin)


def reference_forward(x, w_ih, w_hh, bias, w_lin, b_lin, hidden_size):
    """Pure-JAX reference (matches PyTorch single-layer batch_first LSTM + Linear)."""
    H = hidden_size
    B, T, _ = x.shape
    h = jnp.zeros((B, H), jnp.float32)
    c = jnp.zeros((B, H), jnp.float32)
    for t in range(T):
        gates = x[:, t, :] @ w_ih + h @ w_hh + bias
        i_g = jax.nn.sigmoid(gates[:, 0 * H:1 * H])
        f_g = jax.nn.sigmoid(gates[:, 1 * H:2 * H])
        g_g = jnp.tanh(gates[:, 2 * H:3 * H])
        o_g = jax.nn.sigmoid(gates[:, 3 * H:4 * H])
        c = f_g * c + i_g * g_g
        h = o_g * jnp.tanh(c)
    return h @ w_lin.T + b_lin


if __name__ == "__main__":
    # Small shapes consistent with the module: single-layer LSTM over
    # (batch, seq, num_attributes) windows, hidden_size projected to 1.
    B, T, A, H = 2, 8, 8, 32

    key = jax.random.PRNGKey(0)
    ks = jax.random.split(key, 7)
    bound = 1.0 / jnp.sqrt(H)  # mimic PyTorch nn.LSTM / nn.Linear uniform init

    x = jax.random.normal(ks[0], (B, T, A), dtype=jnp.float32)
    # PyTorch weight_ih_l0 is (4H, A); we store its transpose (A, 4H). Same for hh.
    w_ih = jax.random.uniform(ks[1], (A, 4 * H), minval=-bound, maxval=bound, dtype=jnp.float32)
    w_hh = jax.random.uniform(ks[2], (H, 4 * H), minval=-bound, maxval=bound, dtype=jnp.float32)
    bias_ih = jax.random.uniform(ks[3], (1, 4 * H), minval=-bound, maxval=bound, dtype=jnp.float32)
    bias_hh = jax.random.uniform(ks[4], (1, 4 * H), minval=-bound, maxval=bound, dtype=jnp.float32)
    bias = bias_ih + bias_hh
    # Linear weight kept in its native PyTorch layout (out_features=1, in_features=H).
    w_lin = jax.random.uniform(ks[5], (1, H), minval=-bound, maxval=bound, dtype=jnp.float32)
    b_lin = jax.random.uniform(ks[6], (1, 1), minval=-bound, maxval=bound, dtype=jnp.float32)

    y_ref = reference_forward(x, w_ih, w_hh, bias, w_lin, b_lin, H)

    # Exact f32 matmul operands (also the v5e recommendation).
    y = jax.block_until_ready(
        lstm_model1_forward(x, w_ih, w_hh, bias, w_lin, b_lin, hidden_size=H))
    assert y.shape == (B, 1)
    assert jnp.allclose(y, y_ref, atol=1e-5, rtol=1e-5), (y, y_ref)

    # bf16 matmul operands (v6e / v7x MXU-native path); h/c state stays f32 in-kernel.
    y_bf16 = jax.block_until_ready(
        lstm_model1_forward(x, w_ih, w_hh, bias, w_lin, b_lin, hidden_size=H,
                            matmul_dtype=jnp.bfloat16))
    assert y_bf16.shape == (B, 1)
    assert jnp.allclose(y_bf16, y_ref, atol=5e-2, rtol=5e-2), (y_bf16, y_ref)

    print("KERNEL_OK")
</pallas_src>

<mosaic_0001>
module attributes {stable_mosaic.version = 11 : i64} {
  func.func @_lstm_kernel(%arg0: memref<16x8xf32, #tpu.memory_space<vmem>>, %arg1: memref<8x128xf32, #tpu.memory_space<vmem>>, %arg2: memref<32x128xf32, #tpu.memory_space<vmem>>, %arg3: memref<1x128xf32, #tpu.memory_space<vmem>>, %arg4: memref<1x32xf32, #tpu.memory_space<vmem>>, %arg5: memref<1x1xf32, #tpu.memory_space<vmem>>, %arg6: memref<2x1xf32, #tpu.memory_space<vmem>>, %arg7: memref<16x128xf32, #tpu.memory_space<vmem>>) attributes {dimension_semantics = [], scalar_prefetch = 0 : i64, scratch_operands = 1 : i64, tpu.core_type = #tpu.core_type<tc>} {
    %c0 = arith.constant 0 : index
    %c0_0 = arith.constant 0 : index
    %0 = vector.load %arg1[%c0, %c0_0] : memref<8x128xf32, #tpu.memory_space<vmem>>, vector<8x128xf32>
    %c0_1 = arith.constant 0 : index
    %c0_2 = arith.constant 0 : index
    %1 = vector.load %arg2[%c0_1, %c0_2] : memref<32x128xf32, #tpu.memory_space<vmem>>, vector<32x128xf32>
    %c0_3 = arith.constant 0 : index
    %c0_4 = arith.constant 0 : index
    %2 = vector.load %arg3[%c0_3, %c0_4] : memref<1x128xf32, #tpu.memory_space<vmem>>, vector<1x128xf32>
    %c0_5 = arith.constant 0 : index
    %c0_6 = arith.constant 0 : index
    %3 = vector.load %arg0[%c0_5, %c0_6] : memref<16x8xf32, #tpu.memory_space<vmem>>, vector<16x8xf32>
    %cst = arith.constant dense<0.000000e+00> : vector<16x128xf32>
    %4 = tpu.matmul %3, %0, %cst {dimension_numbers = #tpu.dot_dimension_numbers<[1], [0], [0], [1], [0, 0, 1, 1], [], []>} : vector<16x8xf32>, vector<8x128xf32>, vector<16x128xf32> -> vector<16x128xf32>
    %5 = vector.broadcast %2 : vector<1x128xf32> to vector<16x128xf32>
    %6 = arith.addf %4, %5 : vector<16x128xf32>
    %c0_7 = arith.constant 0 : index
    %c0_8 = arith.constant 0 : index
    %7 = vector.load %arg7[%c0_7, %c0_8] : memref<16x128xf32, #tpu.memory_space<vmem>>, vector<16x128xf32>
    tpu.vector_store %arg7[%c0_7, %c0_8], %6 {strides = array<i32>} : memref<16x128xf32, #tpu.memory_space<vmem>>, vector<16x128xf32>,
    %cst_9 = arith.constant 0.000000e+00 : f32
    %8 = vector.broadcast %cst_9 : f32 to vector<2x32xf32>
    %cst_10 = arith.constant 0.000000e+00 : f32
    %9 = vector.broadcast %cst_10 : f32 to vector<2x32xf32>
    %c0_11 = arith.constant 0 : index
    %c0_12 = arith.constant 0 : index
    %10 = vector.load %arg7[%c0_11, %c0_12] : memref<16x128xf32, #tpu.memory_space<vmem>>, vector<2x128xf32>
    %cst_13 = arith.constant dense<0.000000e+00> : vector<2x128xf32>
    %11 = tpu.matmul %8, %1, %cst_13 {dimension_numbers = #tpu.dot_dimension_numbers<[1], [0], [0], [1], [0, 0, 1, 1], [], []>} : vector<2x32xf32>, vector<32x128xf32>, vector<2x128xf32> -> vector<2x128xf32>
    %12 = arith.addf %10, %11 : vector<2x128xf32>
    %13 = arith.negf %12 : vector<2x128xf32>
    %14 = math.exp %13 : vector<2x128xf32>
    %cst_14 = arith.constant 1.000000e+00 : f32
    %15 = vector.broadcast %cst_14 : f32 to vector<2x128xf32>
    %16 = arith.addf %15, %14 : vector<2x128xf32>
    %17 = arith.divf %15, %16 : vector<2x128xf32>
    %18 = math.tanh %12 : vector<2x128xf32>
    %19 = vector.extract_strided_slice %17 {offsets = [0, 32], sizes = [2, 32], strides = [1, 1]} : vector<2x128xf32> to vector<2x32xf32>
    %20 = arith.mulf %19, %9 : vector<2x32xf32>
    %21 = vector.extract_strided_slice %17 {offsets = [0, 0], sizes = [2, 32], strides = [1, 1]} : vector<2x128xf32> to vector<2x32xf32>
    %22 = vector.extract_strided_slice %18 {offsets = [0, 64], sizes = [2, 32], strides = [1, 1]} : vector<2x128xf32> to vector<2x32xf32>
    %23 = arith.mulf %21, %22 : vector<2x32xf32>
    %24 = arith.addf %20, %23 : vector<2x32xf32>
    %25 = vector.extract_strided_slice %17 {offsets = [0, 96], sizes = [2, 32], strides = [1, 1]} : vector<2x128xf32> to vector<2x32xf32>
    %26 = math.tanh %24 : vector<2x32xf32>
    %27 = arith.mulf %25, %26 : vector<2x32xf32>
    %c2 = arith.constant 2 : index
    %c0_15 = arith.constant 0 : index
    %28 = vector.load %arg7[%c2, %c0_15] : memref<16x128xf32, #tpu.memory_space<vmem>>, vector<2x128xf32>
    %cst_16 = arith.constant dense<0.000000e+00> : vector<2x128xf32>
    %29 = tpu.matmul %27, %1, %cst_16 {dimension_numbers = #tpu.dot_dimension_numbers<[1], [0], [0], [1], [0, 0, 1, 1], [], []>} : vector<2x32xf32>, vector<32x128xf32>, vector<2x128xf32> -> vector<2x128xf32>
    %30 = arith.addf %28, %29 : vector<2x128xf32>
    %31 = arith.negf %30 : vector<2x128xf32>
    %32 = math.exp %31 : vector<2x128xf32>
    %cst_17 = arith.constant 1.000000e+00 : f32
    %33 = vector.broadcast %cst_17 : f32 to vector<2x128xf32>
    %34 = arith.addf %33, %32 : vector<2x128xf32>
    %35 = arith.divf %33, %34 : vector<2x128xf32>
    %36 = math.tanh %30 : vector<2x128xf32>
    %37 = vector.extract_strided_slice %35 {offsets = [0, 32], sizes = [2, 32], strides = [1, 1]} : vector<2x128xf32> to vector<2x32xf32>
    %38 = arith.mulf %37, %24 : vector<2x32xf32>
    %39 = vector.extract_strided_slice %35 {offsets = [0, 0], sizes = [2, 32], strides = [1, 1]} : vector<2x128xf32> to vector<2x32xf32>
    %40 = vector.extract_strided_slice %36 {offsets = [0, 64], sizes = [2, 32], strides = [1, 1]} : vector<2x128xf32> to vector<2x32xf32>
    %41 = arith.mulf %39, %40 : vector<2x32xf32>
    %42 = arith.addf %38, %41 : vector<2x32xf32>
    %43 = vector.extract_strided_slice %35 {offsets = [0, 96], sizes = [2, 32], strides = [1, 1]} : vector<2x128xf32> to vector<2x32xf32>
    %44 = math.tanh %42 : vector<2x32xf32>
    %45 = arith.mulf %43, %44 : vector<2x32xf32>
    %c4 = arith.constant 4 : index
    %c0_18 = arith.constant 0 : index
    %46 = vector.load %arg7[%c4, %c0_18] : memref<16x128xf32, #tpu.memory_space<vmem>>, vector<2x128xf32>
    %cst_19 = arith.constant dense<0.000000e+00> : vector<2x128xf32>
    %47 = tpu.matmul %45, %1, %cst_19 {dimension_numbers = #tpu.dot_dimension_numbers<[1], [0], [0], [1], [0, 0, 1, 1], [], []>} : vector<2x32xf32>, vector<32x128xf32>, vector<2x128xf32> -> vector<2x128xf32>
    %48 = arith.addf %46, %47 : vector<2x128xf32>
    %49 = arith.negf %48 : vector<2x128xf32>
    %50 = math.exp %49 : vector<2x128xf32>
    %cst_20 = arith.constant 1.000000e+00 : f32
    %51 = vector.broadcast %cst_20 : f32 to vector<2x128xf32>
    %52 = arith.addf %51, %50 : vector<2x128xf32>
    %53 = arith.divf %51, %52 : vector<2x128xf32>
    %54 = math.tanh %48 : vector<2x128xf32>
    %55 = vector.extract_strided_slice %53 {offsets = [0, 32], sizes = [2, 32], strides = [1, 1]} : vector<2x128xf32> to vector<2x32xf32>
    %56 = arith.mulf %55, %42 : vector<2x32xf32>
    %57 = vector.extract_strided_slice %53 {offsets = [0, 0], sizes = [2, 32], strides = [1, 1]} : vector<2x128xf32> to vector<2x32xf32>
    %58 = vector.extract_strided_slice %54 {offsets = [0, 64], sizes = [2, 32], strides = [1, 1]} : vector<2x128xf32> to vector<2x32xf32>
    %59 = arith.mulf %57, %58 : vector<2x32xf32>
    %60 = arith.addf %56, %59 : vector<2x32xf32>
    %61 = vector.extract_strided_slice %53 {offsets = [0, 96], sizes = [2, 32], strides = [1, 1]} : vector<2x128xf32> to vector<2x32xf32>
    %62 = math.tanh %60 : vector<2x32xf32>
    %63 = arith.mulf %61, %62 : vector<2x32xf32>
    %c6 = arith.constant 6 : index
    %c0_21 = arith.constant 0 : index
    %64 = vector.load %arg7[%c6, %c0_21] : memref<16x128xf32, #tpu.memory_space<vmem>>, vector<2x128xf32>
    %cst_22 = arith.constant dense<0.000000e+00> : vector<2x128xf32>
    %65 = tpu.matmul %63, %1, %cst_22 {dimension_numbers = #tpu.dot_dimension_numbers<[1], [0], [0], [1], [0, 0, 1, 1], [], []>} : vector<2x32xf32>, vector<32x128xf32>, vector<2x128xf32> -> vector<2x128xf32>
    %66 = arith.addf %64, %65 : vector<2x128xf32>
    %67 = arith.negf %66 : vector<2x128xf32>
    %68 = math.exp %67 : vector<2x128xf32>
    %cst_23 = arith.constant 1.000000e+00 : f32
    %69 = vector.broadcast %cst_23 : f32 to vector<2x128xf32>
    %70 = arith.addf %69, %68 : vector<2x128xf32>
    %71 = arith.divf %69, %70 : vector<2x128xf32>
    %72 = math.tanh %66 : vector<2x128xf32>
    %73 = vector.extract_strided_slice %71 {offsets = [0, 32], sizes = [2, 32], strides = [1, 1]} : vector<2x128xf32> to vector<2x32xf32>
    %74 = arith.mulf %73, %60 : vector<2x32xf32>
    %75 = vector.extract_strided_slice %71 {offsets = [0, 0], sizes = [2, 32], strides = [1, 1]} : vector<2x128xf32> to vector<2x32xf32>
    %76 = vector.extract_strided_slice %72 {offsets = [0, 64], sizes = [2, 32], strides = [1, 1]} : vector<2x128xf32> to vector<2x32xf32>
    %77 = arith.mulf %75, %76 : vector<2x32xf32>
    %78 = arith.addf %74, %77 : vector<2x32xf32>
    %79 = vector.extract_strided_slice %71 {offsets = [0, 96], sizes = [2, 32], strides = [1, 1]} : vector<2x128xf32> to vector<2x32xf32>
    %80 = math.tanh %78 : vector<2x32xf32>
    %81 = arith.mulf %79, %80 : vector<2x32xf32>
    %c8 = arith.constant 8 : index
    %c0_24 = arith.constant 0 : index
    %82 = vector.load %arg7[%c8, %c0_24] : memref<16x128xf32, #tpu.memory_space<vmem>>, vector<2x128xf32>
    %cst_25 = arith.constant dense<0.000000e+00> : vector<2x128xf32>
    %83 = tpu.matmul %81, %1, %cst_25 {dimension_numbers = #tpu.dot_dimension_numbers<[1], [0], [0], [1], [0, 0, 1, 1], [], []>} : vector<2x32xf32>, vector<32x128xf32>, vector<2x128xf32> -> vector<2x128xf32>
    %84 = arith.addf %82, %83 : vector<2x128xf32>
    %85 = arith.negf %84 : vector<2x128xf32>
    %86 = math.exp %85 : vector<2x128xf32>
    %cst_26 = arith.constant 1.000000e+00 : f32
    %87 = vector.broadcast %cst_26 : f32 to vector<2x128xf32>
    %88 = arith.addf %87, %86 : vector<2x128xf32>
    %89 = arith.divf %87, %88 : vector<2x128xf32>
    %90 = math.tanh %84 : vector<2x128xf32>
    %91 = vector.extract_strided_slice %89 {offsets = [0, 32], sizes = [2, 32], strides = [1, 1]} : vector<2x128xf32> to vector<2x32xf32>
    %92 = arith.mulf %91, %78 : vector<2x32xf32>
    %93 = vector.extract_strided_slice %89 {offsets = [0, 0], sizes = [2, 32], strides = [1, 1]} : vector<2x128xf32> to vector<2x32xf32>
    %94 = vector.extract_strided_slice %90 {offsets = [0, 64], sizes = [2, 32], strides = [1, 1]} : vector<2x128xf32> to vector<2x32xf32>
    %95 = arith.mulf %93, %94 : vector<2x32xf32>
    %96 = arith.addf %92, %95 : vector<2x32xf32>
    %97 = vector.extract_strided_slice %89 {offsets = [0, 96], sizes = [2, 32], strides = [1, 1]} : vector<2x128xf32> to vector<2x32xf32>
    %98 = math.tanh %96 : vector<2x32xf32>
    %99 = arith.mulf %97, %98 : vector<2x32xf32>
    %c10 = arith.constant 10 : index
    %c0_27 = arith.constant 0 : index
    %100 = vector.load %arg7[%c10, %c0_27] : memref<16x128xf32, #tpu.memory_space<vmem>>, vector<2x128xf32>
    %cst_28 = arith.constant dense<0.000000e+00> : vector<2x128xf32>
    %101 = tpu.matmul %99, %1, %cst_28 {dimension_numbers = #tpu.dot_dimension_numbers<[1], [0], [0], [1], [0, 0, 1, 1], [], []>} : vector<2x32xf32>, vector<32x128xf32>, vector<2x128xf32> -> vector<2x128xf32>
    %102 = arith.addf %100, %101 : vector<2x128xf32>
    %103 = arith.negf %102 : vector<2x128xf32>
    %104 = math.exp %103 : vector<2x128xf32>
    %cst_29 = arith.constant 1.000000e+00 : f32
    %105 = vector.broadcast %cst_29 : f32 to vector<2x128xf32>
    %106 = arith.addf %105, %104 : vector<2x128xf32>
    %107 = arith.divf %105, %106 : vector<2x128xf32>
    %108 = math.tanh %102 : vector<2x128xf32>
    %109 = vector.extract_strided_slice %107 {offsets = [0, 32], sizes = [2, 32], strides = [1, 1]} : vector<2x128xf32> to vector<2x32xf32>
    %110 = arith.mulf %109, %96 : vector<2x32xf32>
    %111 = vector.extract_strided_slice %107 {offsets = [0, 0], sizes = [2, 32], strides = [1, 1]} : vector<2x128xf32> to vector<2x32xf32>
    %112 = vector.extract_strided_slice %108 {offsets = [0, 64], sizes = [2, 32], strides = [1, 1]} : vector<2x128xf32> to vector<2x32xf32>
    %113 = arith.mulf %111, %112 : vector<2x32xf32>
    %114 = arith.addf %110, %113 : vector<2x32xf32>
    %115 = vector.extract_strided_slice %107 {offsets = [0, 96], sizes = [2, 32], strides = [1, 1]} : vector<2x128xf32> to vector<2x32xf32>
    %116 = math.tanh %114 : vector<2x32xf32>
    %117 = arith.mulf %115, %116 : vector<2x32xf32>
    %c12 = arith.constant 12 : index
    %c0_30 = arith.constant 0 : index
    %118 = vector.load %arg7[%c12, %c0_30] : memref<16x128xf32, #tpu.memory_space<vmem>>, vector<2x128xf32>
    %cst_31 = arith.constant dense<0.000000e+00> : vector<2x128xf32>
    %119 = tpu.matmul %117, %1, %cst_31 {dimension_numbers = #tpu.dot_dimension_numbers<[1], [0], [0], [1], [0, 0, 1, 1], [], []>} : vector<2x32xf32>, vector<32x128xf32>, vector<2x128xf32> -> vector<2x128xf32>
    %120 = arith.addf %118, %119 : vector<2x128xf32>
    %121 = arith.negf %120 : vector<2x128xf32>
    %122 = math.exp %121 : vector<2x128xf32>
    %cst_32 = arith.constant 1.000000e+00 : f32
    %123 = vector.broadcast %cst_32 : f32 to vector<2x128xf32>
    %124 = arith.addf %123, %122 : vector<2x128xf32>
    %125 = arith.divf %123, %124 : vector<2x128xf32>
    %126 = math.tanh %120 : vector<2x128xf32>
    %127 = vector.extract_strided_slice %125 {offsets = [0, 32], sizes = [2, 32], strides = [1, 1]} : vector<2x128xf32> to vector<2x32xf32>
    %128 = arith.mulf %127, %114 : vector<2x32xf32>
    %129 = vector.extract_strided_slice %125 {offsets = [0, 0], sizes = [2, 32], strides = [1, 1]} : vector<2x128xf32> to vector<2x32xf32>
    %130 = vector.extract_strided_slice %126 {offsets = [0, 64], sizes = [2, 32], strides = [1, 1]} : vector<2x128xf32> to vector<2x32xf32>
    %131 = arith.mulf %129, %130 : vector<2x32xf32>
    %132 = arith.addf %128, %131 : vector<2x32xf32>
    %133 = vector.extract_strided_slice %125 {offsets = [0, 96], sizes = [2, 32], strides = [1, 1]} : vector<2x128xf32> to vector<2x32xf32>
    %134 = math.tanh %132 : vector<2x32xf32>
    %135 = arith.mulf %133, %134 : vector<2x32xf32>
    %c14 = arith.constant 14 : index
    %c0_33 = arith.constant 0 : index
    %136 = vector.load %arg7[%c14, %c0_33] : memref<16x128xf32, #tpu.memory_space<vmem>>, vector<2x128xf32>
    %cst_34 = arith.constant dense<0.000000e+00> : vector<2x128xf32>
    %137 = tpu.matmul %135, %1, %cst_34 {dimension_numbers = #tpu.dot_dimension_numbers<[1], [0], [0], [1], [0, 0, 1, 1], [], []>} : vector<2x32xf32>, vector<32x128xf32>, vector<2x128xf32> -> vector<2x128xf32>
    %138 = arith.addf %136, %137 : vector<2x128xf32>
    %139 = arith.negf %138 : vector<2x128xf32>
    %140 = math.exp %139 : vector<2x128xf32>
    %cst_35 = arith.constant 1.000000e+00 : f32
    %141 = vector.broadcast %cst_35 : f32 to vector<2x128xf32>
    %142 = arith.addf %141, %140 : vector<2x128xf32>
    %143 = arith.divf %141, %142 : vector<2x128xf32>
    %144 = math.tanh %138 : vector<2x128xf32>
    %145 = vector.extract_strided_slice %143 {offsets = [0, 32], sizes = [2, 32], strides = [1, 1]} : vector<2x128xf32> to vector<2x32xf32>
    %146 = arith.mulf %145, %132 : vector<2x32xf32>
    %147 = vector.extract_strided_slice %143 {offsets = [0, 0], sizes = [2, 32], strides = [1, 1]} : vector<2x128xf32> to vector<2x32xf32>
    %148 = vector.extract_strided_slice %144 {offsets = [0, 64], sizes = [2, 32], strides = [1, 1]} : vector<2x128xf32> to vector<2x32xf32>
    %149 = arith.mulf %147, %148 : vector<2x32xf32>
    %150 = arith.addf %146, %149 : vector<2x32xf32>
    %151 = vector.extract_strided_slice %143 {offsets = [0, 96], sizes = [2, 32], strides = [1, 1]} : vector<2x128xf32> to vector<2x32xf32>
    %152 = math.tanh %150 : vector<2x32xf32>
    %153 = arith.mulf %151, %152 : vector<2x32xf32>
    %c0_36 = arith.constant 0 : index
    %c0_37 = arith.constant 0 : index
    %154 = vector.load %arg4[%c0_36, %c0_37] : memref<1x32xf32, #tpu.memory_space<vmem>>, vector<1x32xf32>
    %c0_38 = arith.constant 0 : index
    %c0_39 = arith.constant 0 : index
    %155 = vector.load %arg5[%c0_38, %c0_39] : memref<1x1xf32, #tpu.memory_space<vmem>>, vector<1x1xf32>
    %156 = vector.broadcast %154 : vector<1x32xf32> to vector<2x32xf32>
    %157 = arith.mulf %153, %156 : vector<2x32xf32>
    %cst_40 = arith.constant dense<0.000000e+00> : vector<2xf32>
    %158 = vector.multi_reduction <add>, %157, %cst_40 [1] : vector<2x32xf32> to vector<2xf32>
    %159 = vector.shape_cast %158 : vector<2xf32> to vector<2x1xf32>
    %160 = vector.broadcast %155 : vector<1x1xf32> to vector<2x1xf32>
    %161 = arith.addf %159, %160 : vector<2x1xf32>
    %c0_41 = arith.constant 0 : index
    %c0_42 = arith.constant 0 : index
    %162 = vector.load %arg6[%c0_41, %c0_42] : memref<2x1xf32, #tpu.memory_space<vmem>>, vector<2x1xf32>
    tpu.vector_store %arg6[%c0_41, %c0_42], %161 {strides = array<i32>} : memref<2x1xf32, #tpu.memory_space<vmem>>, vector<2x1xf32>,
    return
  }
}

</mosaic_0001>

<bundles_post_ra>
// kernel: tpu_custom_call.1
= control target key start
LH: loop header
LB: loop body
LE: loop exit
PB: predicated region body
PF: predicated region fallthrough
CT: control target
= control target key end

     0   :  { %s1422_s0 = inlined_call_operand.vmem [shape: f32[16,8], index: 0, kind: input, shape index: {}]   ;;  %s1423_s1 = inlined_call_operand.vmem [shape: f32[8,128], index: 1, kind: input, shape index: {}]   ;;  %s1424_s2 = inlined_call_operand.hbm [shape: f32[32,128], index: 2, kind: input, shape index: {}]   ;;  %s1425_s3 = inlined_call_operand.vmem [shape: f32[1,128], index: 3, kind: input, shape index: {}]   ;;  %s1426_s4 = inlined_call_operand.vmem [shape: f32[1,32], index: 4, kind: input, shape index: {}]   ;;  %s1427_s5 = inlined_call_operand.<no memory space> [shape: f32[1,1], index: 5, kind: input, shape index: {}]   ;;  %s1428_s6 = inlined_call_operand.vmem [shape: f32[2,1], index: 6, kind: output, shape index: {}]  }
   0x1   :  { %v11_v0 = vstv %s1427_s5 }
   0x2   :  { %12 = vst [vmem:[#allocation3] sm:$0x1] %v11_v0 }
   0x3   :  { %13 = vsyncpa [#allocation5], 0  ;;  %s1227_s23 = smov [#allocation4]  }
   0x4   :  { %s23_s24 = sshll.u32 %s1227_s23, 4  ;;  %s24_s24 = int_to_ptr.vmem [resolvable:$true] %s23_s24 }
   0x5   :  { %s1213_s25 = scalar_lea.vmem %s24_s24, 512  ;;  %p1218_p1 = scmp.lt.s32.totalorder %s24_s24, %s24_s24 }
   0x6   :  { %p1214_p0 = scmp.ne.s32.totalorder %s24_s24, %s1213_s25  ;;  %p1219_p2 = scmp.lt.s32.totalorder %s1213_s25, %s1213_s25 }
   0x8   :  { %p1220_p3 = por %p1219_p2, %p1218_p1 }
   0xa   :  { %p1221_p4 = pnand %p1220_p3, %p1214_p0 }
   0xc   :  { %1224 = shalt.err (!%p1221_p4)
}
   0xd   :  { %s1228_s26 = smov 128   ;;  %s1229_s27 = smov 8  }
   0xe   :  { %29 = dma.hbm_to_vmem [thread:$0]  %s1424_s2, 512, %s24_s24, [#allocation5], %s1228_s26, %s1228_s26, %s1229_s27  }
   0xf   :  { %1225 = dma.done.wait [#allocation5], 512  }
  0x10   :  { %1226 = vsyncadd [#allocation5], 4294966784  ;;  %v1230_v1 = vmov 0.0   ;;  %vm1231_vm0 = vmmov 0   ;;  %vm53_vm1 = vcmask 64512   ;;  %v39_v2 = vld [vmem:[%s1423_s1] sm:$0xff] }
  0x11   :  { %1045 = vmatprep.subr.mxu1 %v1230_v1  ;;  %1053 = vmatprep.mubr.msk.f32.mxu1 %vm1231_vm0, %v1230_v1  ;;  %v45_v3 = vld [vmem:[%s1422_s0] sm:$0xff]  ;;  %v46_v4 = vld [vmem:[%s1422_s0 + $0x8] sm:$0xff]  ;;  %v1299_v8 = vld [vmem:[#allocation4] sm:$0xff]  ;;  %s1232_s10 = smov 64   ;;  %vm138_vm2 = vcmask 261120   ;;  %s1234_s13 = smov 96  }
  0x12   :  { %1040 = vmatprep.subr.mxu0 %v39_v2  ;;  %1042 = vmatprep.mubr.msk.f32.mxu0 %vm53_vm1, %v45_v3  ;;  %v1288_v5 = vld [vmem:[#allocation4 + $0x18] sm:$0xff]  ;;  %v1290_v6 = vld [vmem:[#allocation4 + $0x10] sm:$0xff]  ;;  %v1294_v7 = vld [vmem:[#allocation4 + $0x8] sm:$0xff]  ;;  %vm959_vm3 = vcmask 254976   ;;  %vm970_vm4 = vcmask 1024  }
  0x13   :  { %1041 = vmatpush3.msra.mxu0 %v39_v2  ;;  %1046 = vmatpush3.msra.mxu1 %v1288_v5  ;;  %v977_v9 = vld [vmem:[%s1425_s3] ss:$0 sm:$0xff]  ;;  %s1233_s3 = smov 32  }
  0x14   :  { %1043 = vmatmul.mubr.msk.f32.vlgmr.msra.gmra.mxu0 %vm53_vm1, %v46_v4  ;;  %1047 = vmatprep.subr.mxu1 %v1230_v1 }
  0x15   :  { %1048 = vmatpush3.msra.mxu1 %v1290_v6  ;;  %1056 = vmatprep.subr.mxu0 %v1230_v1 }
  0x16   :  { %1049 = vmatprep.subr.mxu1 %v1230_v1  ;;  %1057 = vmatpush3.msra.mxu0 %v1288_v5 }
  0x17   :  { %1050 = vmatpush3.msra.mxu1 %v1294_v7  ;;  %1058 = vmatprep.subr.mxu0 %v1230_v1 }
  0x18   :  { %1051 = vmatprep.subr.mxu1 %v1230_v1  ;;  %1059 = vmatpush3.msra.mxu0 %v1290_v6 }
  0x19   :  { %1052 = vmatpush3.msra.mxu1 %v1299_v8  ;;  %1060 = vmatprep.subr.mxu0 %v1230_v1 }
  0x1a   :  { %1054 = vmatmul.mubr.f32.vlgmr.msra.gmra.mxu1 %v1230_v1  ;;  %1061 = vmatpush3.msra.mxu0 %v1294_v7 }
  0x1b   :  { %1062 = vmatprep.subr.mxu0 %v1230_v1  ;;  %1064 = vmatprep.mubr.msk.f32.mxu0 %vm1231_vm0, %v1230_v1 }
  0x1c   :  { %1063 = vmatpush3.msra.mxu0 %v1299_v8  ;;  %1067 = vmatprep.subr.mxu1 %v1230_v1 }
  0x1d   :  { %1068 = vmatpush3.msra.mxu1 %v1288_v5  ;;  %1075 = vmatprep.mubr.msk.f32.mxu1 %vm1231_vm0, %v1230_v1 }
  0x1e   :  { %1069 = vmatprep.subr.mxu1 %v1230_v1  ;;  %1078 = vmatprep.subr.mxu0 %v1230_v1 }
  0x1f   :  { %1070 = vmatpush3.msra.mxu1 %v1290_v6 }
  0x20   :  { %1071 = vmatprep.subr.mxu1 %v1230_v1 }
  0x21   :  { %1072 = vmatpush3.msra.mxu1 %v1294_v7 }
  0x22   :  { %1073 = vmatprep.subr.mxu1 %v1230_v1 }
  0x23   :  { %1074 = vmatpush3.msra.mxu1 %v1299_v8 }
  0x24   :  { %1089 = vmatprep.subr.mxu1 %v1230_v1 }
  0xd4   :  { %v1044_v10 = vpop.f32.mrf.mxu0 }
  0xd5   :  { %v132_v11 = vadd.f32 %v1044_v10, %v977_v9 }
  0xd6   :  { %v126_v12 = vpop.f32.mrf.mxu0 }
  0xd7   :  { %136 = vst [vmem:[#allocation2 + $0x8] sm:$0xff] %v132_v11  ;;  %v127_v13 = vadd.f32 %v977_v9, %v126_v12 }
  0xd9   :  { %135 = vst [vmem:[#allocation2] sm:$0xff] %v127_v13 }
  0xda   :  { %v208_v14 = vpop.f32.mrf.mxu1 }
  0xdc   :  { %v1055_v15 = vpop.f32.mrf.mxu1 }
  0xe0   :  { %v137_v16 = vld [vmem:[#allocation2] sm:$0x3]  ;;  %v237_v32 = vld [vmem:[#allocation2 + $0x2] sm:$0x3]  ;;  %v338_v50 = vld [vmem:[#allocation2 + $0x4] sm:$0x3] }
  0xe1   :  { %v212_v17 = vadd.f32 %v208_v14, %v137_v16  ;;  %v439_v9 = vld [vmem:[#allocation2 + $0x6] sm:$0x3] }
  0xe3   :  { %1141 = vtanh.f32 %v212_v17  ;;  %v980_v19 = vmul.f32 -1.442695, %v212_v17 }
  0xe5   :  { %1143 = vpow2.f32 %v980_v19 }
  0xf0   :  { %v1142_v18 = vpop.eup %1141 }
  0xf1   :  { %222 = vrot.lane.b32.xlu0 %v1142_v18, %s1232_s10 }
  0xf2   :  { %v1144_v20 = vpop.eup %1143 }
  0xf3   :  { %v216_v21 = vadd.f32 1.0, %v1144_v20 }
  0xf5   :  { %1145 = vrcp.f32 %v216_v21 }
 0x102   :  { %v1146_v22 = vpop.eup %1145 }
 0x103   :  { %v220_v25 = vmul.f32 0.0, %v1146_v22 }
 0x163   :  { %v223_v23 = vpop.permute.xlu0 %222 }
 0x164   :  { %v225_v24 = vmul.f32 %v1146_v22, %v223_v23 }
 0x166   :  { %227 = vrot.lane.b32.xlu0 %v225_v24, %s1233_s3 }
 0x1d8   :  { %v228_v26 = vpop.permute.xlu0 %227 }
 0x1d9   :  { %v230_v27 = vadd.f32 %v228_v26, %v220_v25 }
 0x1db   :  { %1147 = vtanh.f32 %v230_v27 }
 0x1e8   :  { %v1148_v28 = vpop.eup %1147 }
 0x1e9   :  { %233 = vrot.lane.b32.xlu1 %v1148_v28, %s1232_s10 }
 0x25b   :  { %v234_v29 = vpop.permute.xlu1 %233 }
 0x25c   :  { %v236_v30 = vmul.f32 %v1146_v22, %v234_v29 }
 0x25e   :  { %239 = vrot.lane.b32.xlu1 %v236_v30, %s1233_s3 }
 0x2d0   :  { %v240_v31 = vpop.permute.xlu1 %239 }
 0x2d1   :  { %1065 = vmatmul.mubr.msk.f32.vlgmr.msra.gmra.mxu0 %vm138_vm2, %v240_v31 }
 0x2d2   :  { %1079 = vmatpush3.msra.mxu0 %v1288_v5  ;;  %1086 = vmatprep.mubr.msk.f32.mxu0 %vm1231_vm0, %v1230_v1 }
 0x2d3   :  { %1080 = vmatprep.subr.mxu0 %v1230_v1 }
 0x2d4   :  { %1081 = vmatpush3.msra.mxu0 %v1290_v6 }
 0x2d5   :  { %1082 = vmatprep.subr.mxu0 %v1230_v1 }
 0x2d6   :  { %1083 = vmatpush3.msra.mxu0 %v1294_v7 }
 0x2d7   :  { %1084 = vmatprep.subr.mxu0 %v1230_v1 }
 0x2d8   :  { %1085 = vmatpush3.msra.mxu0 %v1299_v8 }
 0x2d9   :  { %1100 = vmatprep.subr.mxu0 %v1230_v1 }
 0x391   :  { %v309_v33 = vpop.f32.mrf.mxu0 }
 0x392   :  { %v313_v34 = vadd.f32 %v309_v33, %v237_v32 }
 0x393   :  { %v1066_v35 = vpop.f32.mrf.mxu0 }
 0x394   :  { %1149 = vtanh.f32 %v313_v34  ;;  %v982_v37 = vmul.f32 -1.442695, %v313_v34 }
 0x396   :  { %1151 = vpow2.f32 %v982_v37 }
 0x3a1   :  { %v1150_v36 = vpop.eup %1149 }
 0x3a2   :  { %323 = vrot.lane.b32.xlu0 %v1150_v36, %s1232_s10 }
 0x3a3   :  { %v1152_v38 = vpop.eup %1151 }
 0x3a4   :  { %v317_v39 = vadd.f32 1.0, %v1152_v38 }
 0x3a6   :  { %1153 = vrcp.f32 %v317_v39 }
 0x3b3   :  { %v1154_v40 = vpop.eup %1153 }
 0x3b4   :  { %v321_v43 = vmul.f32 %v1154_v40, %v230_v27  ;;  %v540_v27 = vld [vmem:[#allocation2 + $0x8] sm:$0x3] }
 0x414   :  { %v324_v41 = vpop.permute.xlu0 %323 }
 0x415   :  { %v326_v42 = vmul.f32 %v1154_v40, %v324_v41 }
 0x417   :  { %328 = vrot.lane.b32.xlu1 %v326_v42, %s1233_s3 }
 0x489   :  { %v329_v44 = vpop.permute.xlu1 %328 }
 0x48a   :  { %v331_v45 = vadd.f32 %v329_v44, %v321_v43 }
 0x48c   :  { %1155 = vtanh.f32 %v331_v45 }
 0x499   :  { %v1156_v46 = vpop.eup %1155 }
 0x49a   :  { %334 = vrot.lane.b32.xlu0 %v1156_v46, %s1232_s10 }
 0x50c   :  { %v335_v47 = vpop.permute.xlu0 %334 }
 0x50d   :  { %v337_v48 = vmul.f32 %v1154_v40, %v335_v47 }
 0x50f   :  { %340 = vrot.lane.b32.xlu1 %v337_v48, %s1233_s3 }
 0x581   :  { %v341_v49 = vpop.permute.xlu1 %340 }
 0x582   :  { %1076 = vmatmul.mubr.msk.f32.vlgmr.msra.gmra.mxu1 %vm138_vm2, %v341_v49 }
 0x583   :  { %1090 = vmatpush3.msra.mxu1 %v1288_v5  ;;  %1097 = vmatprep.mubr.msk.f32.mxu1 %vm1231_vm0, %v1230_v1 }
 0x584   :  { %1091 = vmatprep.subr.mxu1 %v1230_v1 }
 0x585   :  { %1092 = vmatpush3.msra.mxu1 %v1290_v6 }
 0x586   :  { %1093 = vmatprep.subr.mxu1 %v1230_v1 }
 0x587   :  { %1094 = vmatpush3.msra.mxu1 %v1294_v7 }
 0x588   :  { %1095 = vmatprep.subr.mxu1 %v1230_v1 }
 0x589   :  { %1096 = vmatpush3.msra.mxu1 %v1299_v8 }
 0x58a   :  { %1111 = vmatprep.subr.mxu1 %v1230_v1 }
 0x642   :  { %v410_v51 = vpop.f32.mrf.mxu1 }
 0x643   :  { %v414_v52 = vadd.f32 %v410_v51, %v338_v50 }
 0x644   :  { %v1077_v53 = vpop.f32.mrf.mxu1 }
 0x645   :  { %1157 = vtanh.f32 %v414_v52  ;;  %v984_v55 = vmul.f32 -1.442695, %v414_v52 }
 0x647   :  { %1159 = vpow2.f32 %v984_v55 }
 0x652   :  { %v1158_v54 = vpop.eup %1157 }
 0x653   :  { %424 = vrot.lane.b32.xlu0 %v1158_v54, %s1232_s10 }
 0x654   :  { %v1160_v56 = vpop.eup %1159 }
 0x655   :  { %v418_v57 = vadd.f32 1.0, %v1160_v56 }
 0x657   :  { %1161 = vrcp.f32 %v418_v57 }
 0x664   :  { %v1162_v58 = vpop.eup %1161 }
 0x665   :  { %v422_v61 = vmul.f32 %v1162_v58, %v331_v45  ;;  %v641_v45 = vld [vmem:[#allocation2 + $0xa] sm:$0x3] }
 0x6c5   :  { %v425_v59 = vpop.permute.xlu0 %424 }
 0x6c6   :  { %v427_v60 = vmul.f32 %v1162_v58, %v425_v59 }
 0x6c8   :  { %429 = vrot.lane.b32.xlu1 %v427_v60, %s1233_s3 }
 0x73a   :  { %v430_v62 = vpop.permute.xlu1 %429 }
 0x73b   :  { %v432_v63 = vadd.f32 %v430_v62, %v422_v61 }
 0x73d   :  { %1163 = vtanh.f32 %v432_v63 }
 0x74a   :  { %v1164_v0 = vpop.eup %1163 }
 0x74b   :  { %435 = vrot.lane.b32.xlu0 %v1164_v0, %s1232_s10 }
 0x7bd   :  { %v436_v2 = vpop.permute.xlu0 %435 }
 0x7be   :  { %v438_v3 = vmul.f32 %v1162_v58, %v436_v2  ;;  %v742_v58 = vld [vmem:[#allocation2 + $0xc] sm:$0x3] }
 0x7c0   :  { %441 = vrot.lane.b32.xlu1 %v438_v3, %s1233_s3 }
 0x832   :  { %v442_v4 = vpop.permute.xlu1 %441 }
 0x833   :  { %1087 = vmatmul.mubr.msk.f32.vlgmr.msra.gmra.mxu0 %vm138_vm2, %v442_v4 }
 0x834   :  { %1101 = vmatpush3.msra.mxu0 %v1288_v5  ;;  %1108 = vmatprep.mubr.msk.f32.mxu0 %vm1231_vm0, %v1230_v1 }
 0x835   :  { %1102 = vmatprep.subr.mxu0 %v1230_v1 }
 0x836   :  { %1103 = vmatpush3.msra.mxu0 %v1290_v6 }
 0x837   :  { %1104 = vmatprep.subr.mxu0 %v1230_v1 }
 0x838   :  { %1105 = vmatpush3.msra.mxu0 %v1294_v7 }
 0x839   :  { %1106 = vmatprep.subr.mxu0 %v1230_v1 }
 0x83a   :  { %1107 = vmatpush3.msra.mxu0 %v1299_v8 }
 0x83b   :  { %1122 = vmatprep.subr.mxu0 %v1230_v1 }
 0x8f3   :  { %v511_v10 = vpop.f32.mrf.mxu0 }
 0x8f4   :  { %v515_v11 = vadd.f32 %v511_v10, %v439_v9 }
 0x8f5   :  { %v1088_v12 = vpop.f32.mrf.mxu0 }
 0x8f6   :  { %1165 = vtanh.f32 %v515_v11  ;;  %v986_v14 = vmul.f32 -1.442695, %v515_v11 }
 0x8f8   :  { %1167 = vpow2.f32 %v986_v14 }
 0x903   :  { %v1166_v13 = vpop.eup %1165 }
 0x904   :  { %525 = vrot.lane.b32.xlu0 %v1166_v13, %s1232_s10 }
 0x905   :  { %v1168_v15 = vpop.eup %1167 }
 0x906   :  { %v519_v16 = vadd.f32 1.0, %v1168_v15 }
 0x908   :  { %1169 = vrcp.f32 %v519_v16 }
 0x915   :  { %v1170_v17 = vpop.eup %1169 }
 0x916   :  { %v523_v20 = vmul.f32 %v1170_v17, %v432_v63 }
 0x976   :  { %v526_v18 = vpop.permute.xlu0 %525 }
 0x977   :  { %v528_v19 = vmul.f32 %v1170_v17, %v526_v18 }
 0x979   :  { %530 = vrot.lane.b32.xlu1 %v528_v19, %s1233_s3 }
 0x9eb   :  { %v531_v21 = vpop.permute.xlu1 %530 }
 0x9ec   :  { %v533_v22 = vadd.f32 %v531_v21, %v523_v20 }
 0x9ee   :  { %1171 = vtanh.f32 %v533_v22 }
 0x9fb   :  { %v1172_v23 = vpop.eup %1171 }
 0x9fc   :  { %536 = vrot.lane.b32.xlu0 %v1172_v23, %s1232_s10 }
 0xa6e   :  { %v537_v24 = vpop.permute.xlu0 %536 }
 0xa6f   :  { %v539_v25 = vmul.f32 %v1170_v17, %v537_v24  ;;  %v843_v17 = vld [vmem:[#allocation2 + $0xe] sm:$0x3] }
 0xa71   :  { %542 = vrot.lane.b32.xlu1 %v539_v25, %s1233_s3 }
 0xae3   :  { %v543_v26 = vpop.permute.xlu1 %542 }
 0xae4   :  { %1098 = vmatmul.mubr.msk.f32.vlgmr.msra.gmra.mxu1 %vm138_vm2, %v543_v26 }
 0xae5   :  { %1112 = vmatpush3.msra.mxu1 %v1288_v5  ;;  %1119 = vmatprep.mubr.msk.f32.mxu1 %vm1231_vm0, %v1230_v1 }
 0xae6   :  { %1113 = vmatprep.subr.mxu1 %v1230_v1 }
 0xae7   :  { %1114 = vmatpush3.msra.mxu1 %v1290_v6 }
 0xae8   :  { %1115 = vmatprep.subr.mxu1 %v1230_v1 }
 0xae9   :  { %1116 = vmatpush3.msra.mxu1 %v1294_v7 }
 0xaea   :  { %1117 = vmatprep.subr.mxu1 %v1230_v1 }
 0xaeb   :  { %1118 = vmatpush3.msra.mxu1 %v1299_v8 }
 0xba4   :  { %v612_v28 = vpop.f32.mrf.mxu1 }
 0xba5   :  { %v616_v29 = vadd.f32 %v612_v28, %v540_v27  ;;  %v995_v28 = vld [vmem:[%s1426_s4] ss:$0 sm:$0xff] }
 0xba6   :  { %v1099_v30 = vpop.f32.mrf.mxu1 }
 0xba7   :  { %1173 = vtanh.f32 %v616_v29  ;;  %v988_v32 = vmul.f32 -1.442695, %v616_v29 }
 0xba9   :  { %1175 = vpow2.f32 %v988_v32 }
 0xbb4   :  { %v1174_v31 = vpop.eup %1173 }
 0xbb5   :  { %626 = vrot.lane.b32.xlu0 %v1174_v31, %s1232_s10 }
 0xbb6   :  { %v1176_v33 = vpop.eup %1175 }
 0xbb7   :  { %v620_v34 = vadd.f32 1.0, %v1176_v33 }
 0xbb9   :  { %1177 = vrcp.f32 %v620_v34 }
 0xbc6   :  { %v1178_v35 = vpop.eup %1177 }
 0xbc7   :  { %v624_v38 = vmul.f32 %v1178_v35, %v533_v22 }
 0xc27   :  { %v627_v36 = vpop.permute.xlu0 %626 }
 0xc28   :  { %v629_v37 = vmul.f32 %v1178_v35, %v627_v36 }
 0xc2a   :  { %631 = vrot.lane.b32.xlu1 %v629_v37, %s1233_s3 }
 0xc9c   :  { %v632_v39 = vpop.permute.xlu1 %631 }
 0xc9d   :  { %v634_v40 = vadd.f32 %v632_v39, %v624_v38  ;;  %v996_v39 = vld [vmem:[#allocation3] ss:$0 sm:$0xff] }
 0xc9f   :  { %1179 = vtanh.f32 %v634_v40 }
 0xcac   :  { %v1180_v41 = vpop.eup %1179 }
 0xcad   :  { %637 = vrot.lane.b32.xlu0 %v1180_v41, %s1232_s10 }
 0xd1f   :  { %v638_v42 = vpop.permute.xlu0 %637 }
 0xd20   :  { %v640_v43 = vmul.f32 %v1178_v35, %v638_v42 }
 0xd22   :  { %643 = vrot.lane.b32.xlu1 %v640_v43, %s1233_s3 }
 0xd94   :  { %v644_v44 = vpop.permute.xlu1 %643 }
 0xd95   :  { %1109 = vmatmul.mubr.msk.f32.vlgmr.msra.gmra.mxu0 %vm138_vm2, %v644_v44 }
 0xd96   :  { %1123 = vmatpush3.msra.mxu0 %v1288_v5  ;;  %1130 = vmatprep.mubr.msk.f32.mxu0 %vm1231_vm0, %v1230_v1 }
 0xd97   :  { %1124 = vmatprep.subr.mxu0 %v1230_v1 }
 0xd98   :  { %1125 = vmatpush3.msra.mxu0 %v1290_v6 }
 0xd99   :  { %1126 = vmatprep.subr.mxu0 %v1230_v1 }
 0xd9a   :  { %1127 = vmatpush3.msra.mxu0 %v1294_v7 }
 0xd9b   :  { %1128 = vmatprep.subr.mxu0 %v1230_v1 }
 0xd9c   :  { %1129 = vmatpush3.msra.mxu0 %v1299_v8 }
 0xe55   :  { %v713_v46 = vpop.f32.mrf.mxu0 }
 0xe56   :  { %v717_v47 = vadd.f32 %v713_v46, %v641_v45 }
 0xe57   :  { %v1110_v48 = vpop.f32.mrf.mxu0 }
 0xe58   :  { %1181 = vtanh.f32 %v717_v47  ;;  %v990_v49 = vmul.f32 -1.442695, %v717_v47 }
 0xe5a   :  { %1183 = vpow2.f32 %v990_v49 }
 0xe65   :  { %v1182_v5 = vpop.eup %1181 }
 0xe66   :  { %727 = vrot.lane.b32.xlu0 %v1182_v5, %s1232_s10 }
 0xe67   :  { %v1184_v50 = vpop.eup %1183 }
 0xe68   :  { %v721_v6 = vadd.f32 1.0, %v1184_v50 }
 0xe6a   :  { %1185 = vrcp.f32 %v721_v6 }
 0xe77   :  { %v1186_v51 = vpop.eup %1185 }
 0xe78   :  { %v725_v1 = vmul.f32 %v1186_v51, %v634_v40 }
 0xed8   :  { %v728_v52 = vpop.permute.xlu0 %727 }
 0xed9   :  { %v730_v7 = vmul.f32 %v1186_v51, %v728_v52 }
 0xedb   :  { %732 = vrot.lane.b32.xlu1 %v730_v7, %s1233_s3 }
 0xf4d   :  { %v733_v8 = vpop.permute.xlu1 %732 }
 0xf4e   :  { %v735_v53 = vadd.f32 %v733_v8, %v725_v1 }
 0xf50   :  { %1187 = vtanh.f32 %v735_v53 }
 0xf5d   :  { %v1188_v54 = vpop.eup %1187 }
 0xf5e   :  { %738 = vrot.lane.b32.xlu0 %v1188_v54, %s1232_s10 }
 0xfd0   :  { %v739_v55 = vpop.permute.xlu0 %738 }
 0xfd1   :  { %v741_v56 = vmul.f32 %v1186_v51, %v739_v55 }
 0xfd3   :  { %744 = vrot.lane.b32.xlu1 %v741_v56, %s1233_s3 }
0x1045   :  { %v745_v57 = vpop.permute.xlu1 %744 }
0x1046   :  { %1120 = vmatmul.mubr.msk.f32.vlgmr.msra.gmra.mxu1 %vm138_vm2, %v745_v57 }
0x1106   :  { %v814_v59 = vpop.f32.mrf.mxu1 }
0x1107   :  { %v818_v60 = vadd.f32 %v814_v59, %v742_v58 }
0x1108   :  { %v1121_v61 = vpop.f32.mrf.mxu1 }
0x1109   :  { %1189 = vtanh.f32 %v818_v60  ;;  %v992_v63 = vmul.f32 -1.442695, %v818_v60 }
0x110b   :  { %1191 = vpow2.f32 %v992_v63 }
0x1116   :  { %v1190_v62 = vpop.eup %1189 }
0x1117   :  { %828 = vrot.lane.b32.xlu0 %v1190_v62, %s1232_s10 }
0x1118   :  { %v1192_v0 = vpop.eup %1191 }
0x1119   :  { %v822_v2 = vadd.f32 1.0, %v1192_v0 }
0x111b   :  { %1193 = vrcp.f32 %v822_v2 }
0x1128   :  { %v1194_v3 = vpop.eup %1193 }
0x1129   :  { %v826_v10 = vmul.f32 %v1194_v3, %v735_v53 }
0x1189   :  { %v829_v4 = vpop.permute.xlu0 %828 }
0x118a   :  { %v831_v9 = vmul.f32 %v1194_v3, %v829_v4 }
0x118c   :  { %833 = vrot.lane.b32.xlu1 %v831_v9, %s1233_s3 }
0x11fe   :  { %v834_v11 = vpop.permute.xlu1 %833 }
0x11ff   :  { %v836_v12 = vadd.f32 %v834_v11, %v826_v10 }
0x1201   :  { %1195 = vtanh.f32 %v836_v12 }
0x120e   :  { %v1196_v13 = vpop.eup %1195 }
0x120f   :  { %839 = vrot.lane.b32.xlu0 %v1196_v13, %s1232_s10 }
0x1281   :  { %v840_v14 = vpop.permute.xlu0 %839 }
0x1282   :  { %v842_v15 = vmul.f32 %v1194_v3, %v840_v14 }
0x1284   :  { %845 = vrot.lane.b32.xlu1 %v842_v15, %s1233_s3 }
0x12f6   :  { %v846_v16 = vpop.permute.xlu1 %845 }
0x12f7   :  { %1131 = vmatmul.mubr.msk.f32.vlgmr.msra.gmra.mxu0 %vm138_vm2, %v846_v16 }
0x13b7   :  { %v915_v18 = vpop.f32.mrf.mxu0 }
0x13b8   :  { %v919_v19 = vadd.f32 %v915_v18, %v843_v17 }
0x13b9   :  { %v1132_v20 = vpop.f32.mrf.mxu0 }
0x13ba   :  { %1197 = vtanh.f32 %v919_v19  ;;  %v994_v22 = vmul.f32 -1.442695, %v919_v19 }
0x13bc   :  { %1199 = vpow2.f32 %v994_v22 }
0x13c7   :  { %v1198_v21 = vpop.eup %1197 }
0x13c8   :  { %929 = vrot.lane.b32.xlu0 %v1198_v21, %s1232_s10 }
0x13c9   :  { %v1200_v23 = vpop.eup %1199 }
0x13ca   :  { %v923_v24 = vadd.f32 1.0, %v1200_v23 }
0x13cc   :  { %1201 = vrcp.f32 %v923_v24 }
0x13d9   :  { %v1202_v25 = vpop.eup %1201 }
0x13da   :  { %v927_v29 = vmul.f32 %v1202_v25, %v836_v12 }
0x143a   :  { %v930_v26 = vpop.permute.xlu0 %929 }
0x143b   :  { %v932_v27 = vmul.f32 %v1202_v25, %v930_v26 }
0x143d   :  { %934 = vrot.lane.b32.xlu1 %v932_v27, %s1233_s3 }
0x1441   :  { %951 = vrot.lane.b32.xlu1 %v995_v28, %s1234_s13 }
0x14af   :  { %v935_v30 = vpop.permute.xlu1 %934 }
0x14b0   :  { %v937_v31 = vadd.f32 %v935_v30, %v927_v29 }
0x14b2   :  { %1203 = vtanh.f32 %v937_v31 }
0x14b3   :  { %v952_v34 = vpop.permute.xlu1 %951 }
0x14bf   :  { %v1204_v32 = vpop.eup %1203 }
0x14c0   :  { %940 = vrot.lane.b32.xlu0 %v1204_v32, %s1232_s10 }
0x1532   :  { %v941_v33 = vpop.permute.xlu0 %940 }
0x1533   :  { %v943_v35 = vmul.f32 %v1202_v25, %v941_v33 }
0x1535   :  { %v954_v36 = vmul.f32 %v952_v34, %v943_v35 }
0x1537   :  { %956 = vrot.lane.b32.xlu0 %v954_v36, %s1233_s3 }
0x15a9   :  { %v957_v37 = vpop.permute.xlu0 %956 }
0x15aa   :  { %v960_v38 = vsel %vm959_vm3, %v957_v37, 0.0 }
0x15ab   :  { %961 = vadd.xlane.f32.xlu1 %v960_v38 }
0x1634   :  { %v962_v40 = vpop.xlane.xlu1 %961 }
0x1635   :  { %v969_v41 = vadd.f32 %v996_v39, %v962_v40 }
0x1637   :  { %971 = vst.msk [vmem:[%s1428_s6] sm:$0x3] %vm970_vm4, %v969_v41 }
0x1638   :  { %976 = vsyncpa [#allocation5], 1 }

</bundles_post_ra>
